<compile_context>
chip_gen: v7x
topology: tpu7x:2x2x1
jax: 0.10.0
libtpu: 0.0.40
codegen_flags: <defaults>
</compile_context>

<pallas_src>
import functools

import jax
import jax.numpy as jnp
from jax.experimental import pallas as pl
from jax.experimental.pallas import tpu as pltpu


def _round_up(x, m):
    return ((x + m - 1) // m) * m


# --------------------------------------------------------------------------
# Kernel
# --------------------------------------------------------------------------
def _mlp_softplus_kernel(a_ref, t_ref, w1a_ref, w1t_ref, b1_ref, w2_ref, b2_ref, o_ref):
    # a: (TB, alpha_dim)   t: (TB, time_embed_dim)
    wdt = w1a_ref.dtype
    # In-kernel cast of alpha to the weight dtype (bf16 by default): avoids a
    # separate read+write XLA cast pass over alpha in the wrapper.
    a = a_ref[...].astype(wdt)
    te = t_ref[...].astype(jnp.float32)

    # ---- Linear 1 with the concat fused in:
    #      alpha part on the MXU (K = alpha_dim, intentionally NOT padded to
    #      128 -- the kernel is HBM-bound and the MXU has huge slack); time
    #      part as a rank-1 broadcast add on the VPU when time_embed_dim == 1,
    #      else a tiny-K matmul.  Hidden dim is zero-padded to a multiple of
    #      128 so h occupies full, lane-dense vregs.
    h = jnp.dot(a, w1a_ref[...], preferred_element_type=jnp.float32)
    if t_ref.shape[-1] == 1:
        h = h + te * w1t_ref[...].astype(jnp.float32)            # (TB,1)*(1,H) broadcast
    else:
        h = h + jnp.dot(te.astype(wdt), w1t_ref[...],
                        preferred_element_type=jnp.float32)
    h = h + b1_ref[...]
    h = jnp.maximum(h, 0.0)                                       # ReLU

    # ---- Linear 2: (TB, 128) x (128, alpha_dim), f32 accumulation.
    y = jnp.dot(h.astype(w2_ref.dtype), w2_ref[...], preferred_element_type=jnp.float32)
    y = y + b2_ref[...]

    # ---- Softplus (beta=1): stable one-exp form max(y,0)+log1p(exp(-|y|)).
    #      Matches torch's Softplus(threshold=20) within f32 precision.
    # TODO(synk): on v6e/v7x the softplus could run in bf16 (bf16 EUP) if a
    # trace ever shows the EUP slot binding; not worth it while HBM-bound.
    o_ref[...] = (jnp.maximum(y, 0.0) + jnp.log1p(jnp.exp(-jnp.abs(y)))).astype(o_ref.dtype)


# --------------------------------------------------------------------------
# Parameter preparation (outside the hot loop)
# --------------------------------------------------------------------------
def init_params(key, alpha_dim, hidden_dim, timesteps=101, time_embed_dim=1):
    """Deterministic synthetic parameter init (shapes match the nn.Module).
    Weights stored as (in_features, out_features) == transpose of torch Linear.weight."""
    k_emb, k_w1, k_b1, k_w2, k_b2 = jax.random.split(key, 5)
    in_dim = alpha_dim + time_embed_dim
    return {
        "t_embedding": jax.random.normal(k_emb, (timesteps, time_embed_dim), jnp.float32),
        "w1": jax.random.normal(k_w1, (in_dim, hidden_dim), jnp.float32) * (1.0 / jnp.sqrt(in_dim)),
        "b1": jax.random.normal(k_b1, (1, hidden_dim), jnp.float32) * 0.01,
        "w2": jax.random.normal(k_w2, (hidden_dim, alpha_dim), jnp.float32) * (1.0 / jnp.sqrt(hidden_dim)),
        "b2": jax.random.normal(k_b2, (1, alpha_dim), jnp.float32) * 0.01,
    }


def pad_params(params, *, hidden_pad_to=128, compute_dtype=jnp.bfloat16):
    """One-time padding/split of the weights:
      * W1 split into its alpha rows and time-embedding rows (concat fused in-kernel).
      * Hidden dim zero-padded to a multiple of 128 (lane-dense h, full-K 2nd matmul).
      * Output dim is NOT padded (masked 16-lane stores beat an 8x-inflated write).
      * Weights stored in `compute_dtype` (bf16 default: native full-rate MXU dtype
        on v5e/v6e/v7x, half the weight/activation HBM traffic).  Biases stay f32."""
    w1, b1 = params["w1"], params["b1"]          # (in_dim, hidden), (1, hidden)
    w2, b2 = params["w2"], params["b2"]          # (hidden, alpha_dim), (1, alpha_dim)
    emb = params["t_embedding"]                  # (timesteps, time_embed_dim)
    te_dim = emb.shape[1]
    in_dim, hidden = w1.shape
    alpha_dim = w2.shape[1]
    assert in_dim == alpha_dim + te_dim

    h_pad = _round_up(hidden, hidden_pad_to)

    w1a = jnp.zeros((alpha_dim, h_pad), compute_dtype)
    w1a = w1a.at[:, :hidden].set(w1[:alpha_dim].astype(compute_dtype))
    w1t = jnp.zeros((te_dim, h_pad), compute_dtype)
    w1t = w1t.at[:, :hidden].set(w1[alpha_dim:].astype(compute_dtype))
    b1p = jnp.zeros((1, h_pad), jnp.float32).at[:, :hidden].set(b1.astype(jnp.float32))
    w2p = jnp.zeros((h_pad, alpha_dim), compute_dtype)
    w2p = w2p.at[:hidden, :].set(w2.astype(compute_dtype))
    b2p = b2.astype(jnp.float32)

    return {
        "t_embedding": emb.astype(jnp.float32),
        "w1_alpha": w1a,
        "w1_time": w1t,
        "b1": b1p,
        "w2": w2p,
        "b2": b2p,
    }


# --------------------------------------------------------------------------
# Forward
# --------------------------------------------------------------------------
def _forward_xla(alpha_flat, t_embed, pp):
    """Plain fused-XLA fallback for small batches (kernel launch overhead dominates)."""
    h = alpha_flat @ pp["w1_alpha"].astype(jnp.float32) \
        + t_embed @ pp["w1_time"].astype(jnp.float32) + pp["b1"]
    h = jnp.maximum(h, 0.0)
    y = h @ pp["w2"].astype(jnp.float32) + pp["b2"]
    return jnp.maximum(y, 0.0) + jnp.log1p(jnp.exp(-jnp.abs(y)))


def dirichlet_denoiser_forward(alpha_vector, t, padded_params, *,
                               block_b=2048, min_grid_blocks=2,
                               min_kernel_batch=2048):
    """Reproduces DirichletDenoiser.forward.

    alpha_vector: (B, alpha_dim) or (B, alpha_dim, 1) float32
    t:            (B,) integer timesteps
    padded_params: output of pad_params()
    returns:      (B, alpha_dim, 1) float32
    """
    pp = padded_params
    emb = pp["t_embedding"]
    w1a, w1t = pp["w1_alpha"], pp["w1_time"]
    b1, w2, b2 = pp["b1"], pp["w2"], pp["b2"]

    # --- glue (plain JAX): squeeze, embedding gather, optional broadcast ---
    if alpha_vector.ndim == 3 and alpha_vector.shape[-1] == 1:
        alpha_flat = jnp.squeeze(alpha_vector, axis=-1)
    else:
        alpha_flat = alpha_vector
    alpha_flat = alpha_flat.astype(jnp.float32)   # NO cast to bf16 here; done in-kernel

    t_embed = jnp.take(emb, t.astype(jnp.int32), axis=0)          # (Bt, time_embed_dim)
    if t_embed.shape[0] != alpha_flat.shape[0]:
        t_embed = jnp.broadcast_to(t_embed, (alpha_flat.shape[0], t_embed.shape[1]))

    B, a_dim = alpha_flat.shape
    te_dim = t_embed.shape[1]
    h_pad = w1a.shape[1]

    # --- small-batch fallback: pallas_call launch + per-step overhead dominates ---
    if B < min_kernel_batch:
        return _forward_xla(alpha_flat, t_embed, pp)[..., None]

    # --- batch tiling: tile >= 8 sublanes, capped by block_b, and also capped so
    #     that large batches always produce >= min_grid_blocks grid steps (keeps
    #     both v7x TensorCores busy and gives DMA/compute overlap).
    tb = max(8, min(block_b, _round_up(pl.cdiv(B, min_grid_blocks), 8)))
    b_pad = _round_up(B, tb)
    if b_pad != B:
        alpha_flat = jnp.pad(alpha_flat, ((0, b_pad - B), (0, 0)))
        t_embed = jnp.pad(t_embed, ((0, b_pad - B), (0, 0)))
    grid = (b_pad // tb,)

    # VMEM @ tb=2048 (lane-padded to 128 in VMEM, double-buffered activations):
    #   alpha bf16 ~1 MiB, t f32 ~2 MiB, out f32 ~2 MiB, weights resident <0.1 MiB
    #   => ~5-6 MiB total, far under the 32 MiB scoped default on v5e/v6e/v7x.
    out_padded = pl.pallas_call(
        _mlp_softplus_kernel,
        out_shape=jax.ShapeDtypeStruct((b_pad, a_dim), jnp.float32),
        grid=grid,
        in_specs=[
            # If a trace ever shows exposed input DMA, add pipeline_mode=pl.Buffered(3)
            # on these two activation specs.
            pl.BlockSpec((tb, a_dim), lambda i: (i, 0)),        # alpha tile (pipelined)
            pl.BlockSpec((tb, te_dim), lambda i: (i, 0)),       # t-embed tile (pipelined)
            pl.BlockSpec((a_dim, h_pad), lambda i: (0, 0)),     # W1 alpha rows (resident)
            pl.BlockSpec((te_dim, h_pad), lambda i: (0, 0)),    # W1 time rows  (resident)
            pl.BlockSpec((1, h_pad), lambda i: (0, 0)),         # b1            (resident)
            pl.BlockSpec((h_pad, a_dim), lambda i: (0, 0)),     # W2            (resident)
            pl.BlockSpec((1, a_dim), lambda i: (0, 0)),         # b2            (resident)
        ],
        out_specs=pl.BlockSpec((tb, a_dim), lambda i: (i, 0)),  # unpadded 16-wide output
        compiler_params=pltpu.CompilerParams(
            dimension_semantics=("parallel",),                  # megacore split on v7x
        ),
    )(alpha_flat, t_embed, w1a, w1t, b1, w2, b2)

    # Drop padded batch rows (no-op when B % tb == 0), then unsqueeze(-1).
    out = out_padded if b_pad == B else out_padded[:B]
    return out[:, :, None]


# --------------------------------------------------------------------------
# Reference + demo
# --------------------------------------------------------------------------
def _reference(alpha_vector, t, raw_params):
    """Plain-JAX transliteration of the torch forward (f32, Softplus threshold=20)."""
    alpha_flat = jnp.squeeze(alpha_vector, -1) if alpha_vector.ndim == 3 else alpha_vector
    t_emb = jnp.take(raw_params["t_embedding"], t.astype(jnp.int32), axis=0)
    if t_emb.shape[0] != alpha_flat.shape[0]:
        t_emb = jnp.broadcast_to(t_emb, (alpha_flat.shape[0], t_emb.shape[1]))
    comb = jnp.concatenate([alpha_flat, t_emb], axis=-1)
    h = jnp.maximum(comb @ raw_params["w1"] + raw_params["b1"], 0.0)
    y = h @ raw_params["w2"] + raw_params["b2"]
    sp = jnp.where(y > 20.0, y, jnp.log1p(jnp.exp(jnp.minimum(y, 20.0))))
    return sp[..., None]


if __name__ == "__main__":
    key = jax.random.PRNGKey(0)
    k_params, k_alpha, k_t, k_alpha2, k_t2 = jax.random.split(key, 5)

    batch = 2
    alpha_dim = 16
    hidden_dim = 32
    timesteps = 101
    time_embed_dim = 1

    raw_params = init_params(k_params, alpha_dim, hidden_dim, timesteps, time_embed_dim)
    params_bf16 = pad_params(raw_params)                               # default bf16 compute
    params_f32 = pad_params(raw_params, compute_dtype=jnp.float32)     # exact-match mode

    # Input like the PyTorch module's (batch, alpha_dim, 1) alpha vector.
    alpha_vector = jax.nn.softplus(
        jax.random.normal(k_alpha, (batch, alpha_dim, 1), jnp.float32))
    t = jax.random.randint(k_t, (batch,), 0, timesteps, dtype=jnp.int32)
    ref = _reference(alpha_vector, t, raw_params)

    # 1) f32-weight kernel path (min_kernel_batch=0 forces the Pallas kernel even at B=2):
    out_f32 = dirichlet_denoiser_forward(alpha_vector, t, params_f32, min_kernel_batch=0)
    out_f32 = jax.block_until_ready(out_f32)
    assert out_f32.shape == (batch, alpha_dim, 1), out_f32.shape
    assert bool(jnp.all(jnp.isfinite(out_f32)))
    assert bool(jnp.all(out_f32 >= 0.0))
    assert bool(jnp.allclose(out_f32, ref, atol=1e-5, rtol=1e-5)), "f32 kernel mismatch"

    # 2) bf16 (default) kernel path: looser tolerance (bf16 matmuls, f32 accumulation).
    out_bf16 = dirichlet_denoiser_forward(alpha_vector, t, params_bf16, min_kernel_batch=0)
    out_bf16 = jax.block_until_ready(out_bf16)
    assert out_bf16.shape == (batch, alpha_dim, 1)
    assert bool(jnp.all(jnp.isfinite(out_bf16)))
    assert bool(jnp.all(out_bf16 >= 0.0))
    assert bool(jnp.allclose(out_bf16, ref, atol=5e-2, rtol=5e-2)), "bf16 kernel mismatch"

    # 3) Multi-block grid + batch-padding path (B not a multiple of the tile).
    b2 = 300
    alpha2 = jax.nn.softplus(jax.random.normal(k_alpha2, (b2, alpha_dim, 1), jnp.float32))
    t2 = jax.random.randint(k_t2, (b2,), 0, timesteps, dtype=jnp.int32)
    out2 = dirichlet_denoiser_forward(alpha2, t2, params_bf16, min_kernel_batch=0)
    out2 = jax.block_until_ready(out2)
    ref2 = _reference(alpha2, t2, raw_params)
    assert out2.shape == (b2, alpha_dim, 1)
    assert bool(jnp.allclose(out2, ref2, atol=5e-2, rtol=5e-2)), "multi-block mismatch"

    # 4) Small-batch fallback (plain XLA) agrees too.
    out_fb = dirichlet_denoiser_forward(alpha_vector, t, params_f32)   # B=2 < 2048 -> XLA path
    out_fb = jax.block_until_ready(out_fb)
    assert bool(jnp.allclose(out_fb, ref, atol=1e-5, rtol=1e-5)), "fallback mismatch"

    print("KERNEL_OK")
</pallas_src>

<mosaic_0001>
module attributes {stable_mosaic.version = 11 : i64} {
  func.func @_mlp_softplus_kernel(%arg0: i32, %arg1: memref<8x16xf32, #tpu.memory_space<vmem>>, %arg2: memref<8x1xf32, #tpu.memory_space<vmem>>, %arg3: memref<16x128xf32, #tpu.memory_space<vmem>>, %arg4: memref<1x128xf32, #tpu.memory_space<vmem>>, %arg5: memref<1x128xf32, #tpu.memory_space<vmem>>, %arg6: memref<128x16xf32, #tpu.memory_space<vmem>>, %arg7: memref<1x16xf32, #tpu.memory_space<vmem>>, %arg8: memref<8x16xf32, #tpu.memory_space<vmem>>) attributes {dimension_semantics = [#tpu.dimension_semantics<parallel>], iteration_bounds = array<i64: 1>, scalar_prefetch = 0 : i64, scratch_operands = 0 : i64, tpu.core_type = #tpu.core_type<tc>, window_params = [{transform_indices = @transform_0, window_bounds = array<i64: 8, 16>}, {transform_indices = @transform_1, window_bounds = array<i64: 8, 1>}, {pipeline_mode = #tpu.pipeline_mode<synchronous>, transform_indices = @transform_2, window_bounds = array<i64: 16, 128>}, {pipeline_mode = #tpu.pipeline_mode<synchronous>, transform_indices = @transform_3, window_bounds = array<i64: 1, 128>}, {pipeline_mode = #tpu.pipeline_mode<synchronous>, transform_indices = @transform_4, window_bounds = array<i64: 1, 128>}, {pipeline_mode = #tpu.pipeline_mode<synchronous>, transform_indices = @transform_5, window_bounds = array<i64: 128, 16>}, {pipeline_mode = #tpu.pipeline_mode<synchronous>, transform_indices = @transform_6, window_bounds = array<i64: 1, 16>}, {transform_indices = @transform_7, window_bounds = array<i64: 8, 16>}]} {
    %c0 = arith.constant 0 : index
    %c0_0 = arith.constant 0 : index
    %0 = vector.load %arg1[%c0, %c0_0] : memref<8x16xf32, #tpu.memory_space<vmem>>, vector<8x16xf32>
    %c0_1 = arith.constant 0 : index
    %c0_2 = arith.constant 0 : index
    %1 = vector.load %arg2[%c0_1, %c0_2] : memref<8x1xf32, #tpu.memory_space<vmem>>, vector<8x1xf32>
    %c0_3 = arith.constant 0 : index
    %c0_4 = arith.constant 0 : index
    %2 = vector.load %arg3[%c0_3, %c0_4] : memref<16x128xf32, #tpu.memory_space<vmem>>, vector<16x128xf32>
    %cst = arith.constant dense<0.000000e+00> : vector<8x128xf32>
    %3 = tpu.matmul %0, %2, %cst {dimension_numbers = #tpu.dot_dimension_numbers<[1], [0], [0], [1], [0, 0, 1, 1], [], []>} : vector<8x16xf32>, vector<16x128xf32>, vector<8x128xf32> -> vector<8x128xf32>
    %c0_5 = arith.constant 0 : index
    %c0_6 = arith.constant 0 : index
    %4 = vector.load %arg4[%c0_5, %c0_6] : memref<1x128xf32, #tpu.memory_space<vmem>>, vector<1x128xf32>
    %5 = vector.broadcast %1 : vector<8x1xf32> to vector<8x128xf32>
    %6 = vector.broadcast %4 : vector<1x128xf32> to vector<8x128xf32>
    %7 = arith.mulf %5, %6 : vector<8x128xf32>
    %8 = arith.addf %3, %7 : vector<8x128xf32>
    %c0_7 = arith.constant 0 : index
    %c0_8 = arith.constant 0 : index
    %9 = vector.load %arg5[%c0_7, %c0_8] : memref<1x128xf32, #tpu.memory_space<vmem>>, vector<1x128xf32>
    %10 = vector.broadcast %9 : vector<1x128xf32> to vector<8x128xf32>
    %11 = arith.addf %8, %10 : vector<8x128xf32>
    %cst_9 = arith.constant 0.000000e+00 : f32
    %12 = vector.broadcast %cst_9 : f32 to vector<8x128xf32>
    %13 = arith.maximumf %11, %12 : vector<8x128xf32>
    %c0_10 = arith.constant 0 : index
    %c0_11 = arith.constant 0 : index
    %14 = vector.load %arg6[%c0_10, %c0_11] : memref<128x16xf32, #tpu.memory_space<vmem>>, vector<128x16xf32>
    %cst_12 = arith.constant dense<0.000000e+00> : vector<8x16xf32>
    %15 = tpu.matmul %13, %14, %cst_12 {dimension_numbers = #tpu.dot_dimension_numbers<[1], [0], [0], [1], [0, 0, 1, 1], [], []>} : vector<8x128xf32>, vector<128x16xf32>, vector<8x16xf32> -> vector<8x16xf32>
    %c0_13 = arith.constant 0 : index
    %c0_14 = arith.constant 0 : index
    %16 = vector.load %arg7[%c0_13, %c0_14] : memref<1x16xf32, #tpu.memory_space<vmem>>, vector<1x16xf32>
    %17 = vector.broadcast %16 : vector<1x16xf32> to vector<8x16xf32>
    %18 = arith.addf %15, %17 : vector<8x16xf32>
    %cst_15 = arith.constant 0.000000e+00 : f32
    %19 = vector.broadcast %cst_15 : f32 to vector<8x16xf32>
    %20 = arith.maximumf %18, %19 : vector<8x16xf32>
    %21 = math.absf %18 : vector<8x16xf32>
    %cst_16 = arith.constant 0.000000e+00 : f32
    %22 = vector.broadcast %cst_16 : f32 to vector<8x16xf32>
    %23 = arith.subf %22, %21 : vector<8x16xf32>
    %24 = math.exp %23 : vector<8x16xf32>
    %25 = math.log1p %24 : vector<8x16xf32>
    %26 = arith.addf %20, %25 : vector<8x16xf32>
    %c0_17 = arith.constant 0 : index
    %c0_18 = arith.constant 0 : index
    %27 = vector.load %arg8[%c0_17, %c0_18] : memref<8x16xf32, #tpu.memory_space<vmem>>, vector<8x16xf32>
    tpu.vector_store %arg8[%c0_17, %c0_18], %26 {strides = array<i32>} : memref<8x16xf32, #tpu.memory_space<vmem>>, vector<8x16xf32>,
    return
  }
  func.func @transform_0(%arg0: i32) -> (i32, i32) {
    %c0_i32 = arith.constant 0 : i32
    %c0_i32_0 = arith.constant 0 : i32
    return %arg0, %c0_i32 : i32, i32
  }
  func.func @transform_1(%arg0: i32) -> (i32, i32) {
    %c0_i32 = arith.constant 0 : i32
    %c0_i32_0 = arith.constant 0 : i32
    return %arg0, %c0_i32 : i32, i32
  }
  func.func @transform_2(%arg0: i32) -> (i32, i32) {
    %c0_i32 = arith.constant 0 : i32
    %c0_i32_0 = arith.constant 0 : i32
    %c0_i32_1 = arith.constant 0 : i32
    return %c0_i32, %c0_i32_0 : i32, i32
  }
  func.func @transform_3(%arg0: i32) -> (i32, i32) {
    %c0_i32 = arith.constant 0 : i32
    %c0_i32_0 = arith.constant 0 : i32
    %c0_i32_1 = arith.constant 0 : i32
    return %c0_i32, %c0_i32_0 : i32, i32
  }
  func.func @transform_4(%arg0: i32) -> (i32, i32) {
    %c0_i32 = arith.constant 0 : i32
    %c0_i32_0 = arith.constant 0 : i32
    %c0_i32_1 = arith.constant 0 : i32
    return %c0_i32, %c0_i32_0 : i32, i32
  }
  func.func @transform_5(%arg0: i32) -> (i32, i32) {
    %c0_i32 = arith.constant 0 : i32
    %c0_i32_0 = arith.constant 0 : i32
    %c0_i32_1 = arith.constant 0 : i32
    return %c0_i32, %c0_i32_0 : i32, i32
  }
  func.func @transform_6(%arg0: i32) -> (i32, i32) {
    %c0_i32 = arith.constant 0 : i32
    %c0_i32_0 = arith.constant 0 : i32
    %c0_i32_1 = arith.constant 0 : i32
    return %c0_i32, %c0_i32_0 : i32, i32
  }
  func.func @transform_7(%arg0: i32) -> (i32, i32) {
    %c0_i32 = arith.constant 0 : i32
    %c0_i32_0 = arith.constant 0 : i32
    return %arg0, %c0_i32 : i32, i32
  }
}

</mosaic_0001>

<bundles_post_ra>
// kernel: tpu_custom_call.1
= control target key start
LH: loop header
LB: loop body
LE: loop exit
PB: predicated region body
PF: predicated region fallthrough
CT: control target
= control target key end

     0   :  { %v377_v2 = vmov 0.0|0.0   ;;  %vm378_vm0 = vmmov 0   ;;  %v379_v4 = vmov 0.0   ;;  %v380_v8 = vmov 0   ;;  %s507_s0 = inlined_call_operand.vmem [shape: f32[8,16], index: 0, kind: input, shape index: {}]   ;;  %s508_s1 = inlined_call_operand.vmem [shape: f32[8,1], index: 1, kind: input, shape index: {}]   ;;  %s509_s2 = inlined_call_operand.vmem [shape: f32[16,128], index: 2, kind: input, shape index: {}]   ;;  %s510_s3 = inlined_call_operand.vmem [shape: f32[1,128], index: 3, kind: input, shape index: {}]   ;;  %s511_s4 = inlined_call_operand.vmem [shape: f32[1,128], index: 4, kind: input, shape index: {}]   ;;  %s512_s5 = inlined_call_operand.vmem [shape: f32[128,16], index: 5, kind: input, shape index: {}]   ;;  %s513_s6 = inlined_call_operand.vmem [shape: f32[1,16], index: 6, kind: input, shape index: {}]   ;;  %s514_s7 = inlined_call_operand.hbm [shape: f32[8,16], index: 7, kind: output, shape index: {}]  }
   0x1   :  { %v29_v0 = vld [vmem:[%s509_s2] sm:$0xff]  ;;  %v30_v1 = vld [vmem:[%s509_s2 + $0x8] sm:$0xff]  ;;  %316 = vmatprep.subr.bf16.mxu0 %v377_v2  ;;  %278 = vmatprep.mubr.msk.f32.mxu0 %vm378_vm0, %v379_v4  ;;  %v129_v10 = vld [vmem:[%s512_s5 + $0x10] sm:$0xff]  ;;  %vm44_vm1 = vcmask 130048  }
   0x2   :  { %v317_v3 = vpack.c.bf16 %v30_v1, %v29_v0  ;;  %v28_v5 = vld [vmem:[%s508_s1] sm:$0xff]  ;;  %v128_v7 = vld [vmem:[%s512_s5 + $0x8] sm:$0xff]  ;;  %348 = vset.pattern.permute.xlu0 %v380_v8  ;;  %319 = vmatprep.subr.bf16.mxu1 %v377_v2  ;;  %v130_v11 = vld [vmem:[%s512_s5 + $0x18] sm:$0xff] }
   0x3   :  { %v127_v6 = vld [vmem:[%s512_s5] sm:$0xff]  ;;  %34 = vperm.xlu0 %348, %v28_v5   ;;  %v323_v13 = vpack.c.bf16 %v130_v11, %v129_v10  ;;  %313 = vmatprep.mubr.msk.f32.mxu1 %vm378_vm0, %v379_v4  ;;  %v132_v15 = vld [vmem:[%s512_s5 + $0x28] sm:$0xff] }
   0x4   :  { %v320_v9 = vpack.c.bf16 %v128_v7, %v127_v6  ;;  %318 = vmatpush3.bf16.msra.mxu0 %v317_v3  ;;  %v27_v12 = vld [vmem:[%s507_s0] sm:$0xff] }
   0x5   :  { %v131_v14 = vld [vmem:[%s512_s5 + $0x20] sm:$0xff] }
   0x6   :  { %321 = vmatpush3.bf16.msra.mxu1 %v320_v9 }
   0x7   :  { %322 = vmatprep.subr.bf16.mxu1 %v377_v2 }
   0x8   :  { %12 = vsyncpa [#allocation3], 0  ;;  %279 = vmatmul.mubr.msk.f32.vlgmr.msra.gmra.mrb[0].mxu0 %vm44_vm1, %v27_v12  ;;  %v326_v16 = vpack.c.bf16 %v132_v15, %v131_v14  ;;  %v133_v17 = vld [vmem:[%s512_s5 + $0x30] sm:$0xff]  ;;  %v134_v18 = vld [vmem:[%s512_s5 + $0x38] sm:$0xff] }
   0x9   :  { %v329_v19 = vpack.c.bf16 %v134_v18, %v133_v17  ;;  %v135_v20 = vld [vmem:[%s512_s5 + $0x40] sm:$0xff]  ;;  %v136_v21 = vld [vmem:[%s512_s5 + $0x48] sm:$0xff]  ;;  %v137_v23 = vld [vmem:[%s512_s5 + $0x50] sm:$0xff] }
   0xa   :  { %324 = vmatpush3.bf16.msra.mxu1 %v323_v13  ;;  %v332_v22 = vpack.c.bf16 %v136_v21, %v135_v20  ;;  %v138_v24 = vld [vmem:[%s512_s5 + $0x58] sm:$0xff]  ;;  %v139_v26 = vld [vmem:[%s512_s5 + $0x60] sm:$0xff]  ;;  %v140_v27 = vld [vmem:[%s512_s5 + $0x68] sm:$0xff] }
   0xb   :  { %325 = vmatprep.subr.bf16.mxu1 %v377_v2  ;;  %v335_v25 = vpack.c.bf16 %v138_v24, %v137_v23  ;;  %v338_v28 = vpack.c.bf16 %v140_v27, %v139_v26  ;;  %v141_v29 = vld [vmem:[%s512_s5 + $0x70] sm:$0xff]  ;;  %v142_v30 = vld [vmem:[%s512_s5 + $0x78] sm:$0xff]  ;;  %v250_v32 = vld [vmem:[%s510_s3] ss:$0 sm:$0xff]  ;;  %s381_s3 = smov [#allocation2]  }
   0xc   :  { %v341_v31 = vpack.c.bf16 %v142_v30, %v141_v29  ;;  %v252_v36 = vld [vmem:[%s511_s4] ss:$0 sm:$0xff]  ;;  %s242_s4 = sshll.u32 %s381_s3, 4  ;;  %s243_s4 = int_to_ptr.vmem [resolvable:$true] %s242_s4 }
   0xd   :  { %v253_v41 = vld [vmem:[%s513_s6] ss:$0 sm:$0xff]  ;;  %s353_s6 = scalar_lea.vmem %s243_s4, 128  ;;  %p358_p1 = scmp.lt.s32.totalorder %s243_s4, %s243_s4 }
   0xe   :  { %327 = vmatpush3.bf16.msra.mxu1 %v326_v16  ;;  %p354_p0 = scmp.ne.s32.totalorder %s243_s4, %s353_s6  ;;  %p359_p2 = scmp.lt.s32.totalorder %s353_s6, %s353_s6 }
   0xf   :  { %328 = vmatprep.subr.bf16.mxu1 %v377_v2 }
  0x10   :  { %p360_p3 = por %p359_p2, %p358_p1 }
  0x12   :  { %330 = vmatpush3.bf16.msra.mxu1 %v329_v19  ;;  %p361_p4 = pnand %p360_p3, %p354_p0 }
  0x13   :  { %331 = vmatprep.subr.bf16.mxu1 %v377_v2 }
  0x16   :  { %333 = vmatpush3.bf16.msra.mxu1 %v332_v22 }
  0x17   :  { %334 = vmatprep.subr.bf16.mxu1 %v377_v2 }
  0x1a   :  { %336 = vmatpush3.bf16.msra.mxu1 %v335_v25 }
  0x1b   :  { %337 = vmatprep.subr.bf16.mxu1 %v377_v2 }
  0x1e   :  { %339 = vmatpush3.bf16.msra.mxu1 %v338_v28 }
  0x1f   :  { %340 = vmatprep.subr.bf16.mxu1 %v377_v2 }
  0x22   :  { %342 = vmatpush3.bf16.msra.mxu1 %v341_v31 }
  0x82   :  { %v35_v33 = vpop.permute.xlu0 %34 }
  0x83   :  { %v43_v34 = vmul.f32 %v250_v32, %v35_v33 }
  0xdb   :  { %v114_v35 = vpop.f32.mrb[0].mxu0 }
  0xdc   :  { %v115_v37 = vadd.f32 %v114_v35, %v43_v34  ;;  %v280_v38 = vpop.f32.mrb[1].mxu0 }
  0xde   :  { %v125_v39 = vadd.f32 %v252_v36, %v115_v37 }
  0xe0   :  { %v126_v40 = vmax.f32 %v125_v39, 0.0 }
  0xe2   :  { %314 = vmatmul.mubr.f32.vlgmr.msra.gmra.mrb[0].mxu1 %v126_v40 }
 0x1b5   :  { %v216_v42 = vpop.f32.mrb[0].mxu1 }
 0x1b6   :  { %v217_v43 = vadd.f32 %v253_v41, %v216_v42  ;;  %v315_v44 = vpop.f32.mrb[1].mxu1 }
 0x1b8   :  { %v221_v45 = vand.u32 2147483647, %v217_v43  ;;  %v220_v56 = vmax.f32 %v217_v43, 0.0 }
 0x1ba   :  { %v222_v46 = vsub.f32 0.0, %v221_v45 }
 0x1bc   :  { %v223_v47 = vmul.f32 1.442695, %v222_v46 }
 0x1be   :  { %349 = vpow2.f32 %v223_v47 }
 0x1c8   :  { %v350_v48 = vpop.eup %349 }
 0x1c9   :  { %v225_v49 = vadd.f32 1.0, %v350_v48  ;;  %v228_v50 = vmul.f32 -0.5, %v350_v48  ;;  %v231_v52 = vand.u32 2147483647, %v350_v48 }
 0x1cb   :  { %351 = vlog2.f32 %v225_v49  ;;  %v229_v51 = vadd.f32 1.0, %v228_v50  ;;  %vm232_vm2 = vcmp.lt.f32.partialorder %v231_v52, 0.0004427343 }
 0x1cd   :  { %v230_v55 = vmul.f32 %v350_v48, %v229_v51 }
 0x1d5   :  { %v352_v53 = vpop.eup %351 }
 0x1d6   :  { %v227_v54 = vmul.f32 0.6931472, %v352_v53 }
 0x1d8   :  { %v233_v57 = vsel %vm232_vm2, %v230_v55, %v227_v54 }
 0x1d9   :  { %v234_v58 = vadd.f32 %v233_v57, %v220_v56 }
 0x1db   :  { %235 = vst.msk [vmem:[#allocation2] sm:$0xff] %vm44_vm1, %v234_v58 }
 0x1dc   :  { %364 = shalt.err (!%p361_p4)
}
 0x1dd   :  { %s365_s19 = scalar_lea.hbm %s514_s7, 128 }
 0x1de   :  { %p366_p5 = scmp.ne.s32.totalorder %s514_s7, %s365_s19  ;;  %p369_p6 = scmp.lt.u32.totalorder %s365_s19, %s514_s7 }
 0x1e0   :  { %p371_p7 = pnand %p369_p6, %p366_p5 }
 0x1e2   :  { %374 = shalt.err (!%p371_p7)
}
 0x1e3   :  { %245 = dma.vmem_to_hbm [thread:$0]  %s243_s4, 128, %s514_s7, [#allocation3]  }
 0x1e4   :  { %375 = dma.done.wait [#allocation3], 128  }
 0x1e5   :  { %376 = vsyncadd [#allocation3], 4294967168 }
 0x1e6   :  { %249 = vsyncpa [#allocation3], 1 }

</bundles_post_ra>
